<compile_context>
chip_gen: v7x
topology: tpu7x:2x2x1
jax: 0.10.0
libtpu: 0.0.40
codegen_flags: <defaults>
</compile_context>

<pallas_src>
import functools

import jax
import jax.numpy as jnp
from jax import lax
from jax.experimental import pallas as pl
from jax.experimental.pallas import tpu as pltpu


_TM_DEFAULT = 512
_TN_DEFAULT = 512
_TK_DEFAULT = 1024


# ----------------------------------------------------------------------------
# Helpers
# ----------------------------------------------------------------------------
def _round_up(x, m):
    return ((x + m - 1) // m) * m


def _pad2(a, rows, cols):
    r, c = a.shape
    if r == rows and c == cols:
        return a
    return jnp.pad(a, ((0, rows - r), (0, cols - c)))


def _sublane_multiple(dtype):
    # f32 -> 8 rows, bf16 -> 16, int8/fp8 -> 32 (sub-32-bit packs along sublanes).
    return max(8, 32 // jnp.dtype(dtype).itemsize)


@functools.lru_cache(maxsize=1)
def _vmem_capacity_bytes():
    try:
        return int(pltpu.get_tpu_info().vmem_capacity_bytes)
    except Exception:
        return 64 * 1024 * 1024          # conservative fallback (v7x per-core)


def _vmem_budget_bytes():
    # ~80% of physical VMEM: v5e/v6e ≈ 102 MiB, v7x ≈ 51 MiB.  Leaves headroom
    # for Mosaic-internal scratch while letting the BN plan use the large VMEM
    # on v5e/v6e for big batches.
    return int(0.8 * _vmem_capacity_bytes())


def _feature_padding(K, N):
    """Feature-dim padding quanta shared by wrappers and LinearLayer so the
    weight/bias/BN params can be pre-padded once at init (idempotent)."""
    tk = min(_TK_DEFAULT, _round_up(K, 128))
    tn = min(_TN_DEFAULT, _round_up(N, 128))
    return _round_up(K, tk), _round_up(N, tn)


def _tile_candidates(total, cap):
    """Multiples of 128 that divide `total`, descending, capped at `cap`."""
    start = min(total, cap)
    cands = [d for d in range(start, 127, -128) if total % d == 0]
    return cands or [total]


def _fit_bn_tiles(Bp, Kp, Np, in_itemsize, out_itemsize, needs_acc_scratch, budget):
    """Pick (tk, tn) for the full-batch-resident fused-BN plan under a VMEM
    budget.  Shrink tk first (no extra HBM traffic), then tn (each extra N
    tile re-streams the whole activation matrix)."""
    def live(tk, tn):
        acc = Bp * tn * 4 if needs_acc_scratch else 0
        return (2 * Bp * tk * in_itemsize       # x blocks (double-buffered)
                + 2 * tk * tn * in_itemsize     # w blocks
                + 2 * Bp * tn * out_itemsize    # out blocks
                + 4 * tn * 4                    # gamma / beta blocks
                + acc)

    tk_cands = _tile_candidates(Kp, _TK_DEFAULT)
    tn_cands = _tile_candidates(Np, 4096)       # prefer whole N resident
    tn = tn_cands[0]
    tk = tk_cands[0]
    for cand in tk_cands:
        tk = cand
        if live(tk, tn) <= budget:
            return tk, tn
    for cand in tn_cands:
        tn = cand
        if live(tk, tn) <= budget:
            return tk, tn
    # TODO(synk): very large batches need a two-pass (sum / sum-of-squares)
    # batch-tiled BN reduction instead of the full-batch-resident plan.
    return tk, tn


# ----------------------------------------------------------------------------
# Linear kernels: grid = (M//tm, N//tn, K//tk), K innermost ("arbitrary").
#   *_f32out: accumulate directly into the resident f32 output block.
#   *_acc:    f32 VMEM scratch accumulator, cast at the epilogue store.
# ----------------------------------------------------------------------------
def _matmul_kernel_f32out(x_ref, w_ref, o_ref):
    @pl.when(pl.program_id(2) == 0)
    def _():
        o_ref[...] = jnp.zeros_like(o_ref)
    o_ref[...] += jnp.dot(x_ref[...], w_ref[...],
                          preferred_element_type=jnp.float32)


def _matmul_bias_kernel_f32out(x_ref, w_ref, b_ref, o_ref):
    k = pl.program_id(2)

    @pl.when(k == 0)
    def _():
        o_ref[...] = jnp.zeros_like(o_ref)

    o_ref[...] += jnp.dot(x_ref[...], w_ref[...],
                          preferred_element_type=jnp.float32)

    @pl.when(k == pl.num_programs(2) - 1)
    def _():
        # Bias added exactly once, in f32, in the last-k epilogue.
        o_ref[...] += b_ref[...].astype(jnp.float32)


def _matmul_kernel_acc(x_ref, w_ref, o_ref, acc_ref):
    k = pl.program_id(2)

    @pl.when(k == 0)
    def _():
        acc_ref[...] = jnp.zeros_like(acc_ref)

    acc_ref[...] += jnp.dot(x_ref[...], w_ref[...],
                            preferred_element_type=jnp.float32)

    @pl.when(k == pl.num_programs(2) - 1)
    def _():
        o_ref[...] = acc_ref[...].astype(o_ref.dtype)


def _matmul_bias_kernel_acc(x_ref, w_ref, b_ref, o_ref, acc_ref):
    k = pl.program_id(2)

    @pl.when(k == 0)
    def _():
        acc_ref[...] = jnp.zeros_like(acc_ref)

    acc_ref[...] += jnp.dot(x_ref[...], w_ref[...],
                            preferred_element_type=jnp.float32)

    @pl.when(k == pl.num_programs(2) - 1)
    def _():
        o_ref[...] = (acc_ref[...] + b_ref[...].astype(jnp.float32)
                      ).astype(o_ref.dtype)


# ----------------------------------------------------------------------------
# Fused matmul + training-mode BatchNorm1d: grid = (N//tn, K//tk); the FULL
# (padded) batch is resident per column tile so batch statistics are exact.
# Padded rows are excluded from the statistics (division uses the true batch).
# ----------------------------------------------------------------------------
def _bn_normalize(y, gamma, beta, batch, eps):
    inv_b = jnp.float32(1.0 / batch)
    if y.shape[0] != batch:                      # static: batch rows padded
        row = lax.broadcasted_iota(jnp.int32, y.shape, 0)
        valid = row < batch
        y_sum = jnp.where(valid, y, 0.0)
    else:
        valid = None
        y_sum = y
    mean = jnp.sum(y_sum, axis=0, keepdims=True) * inv_b
    diff = y - mean
    dsq = diff if valid is None else jnp.where(valid, diff, 0.0)
    # PyTorch training mode normalizes with the biased variance.
    var = jnp.sum(dsq * dsq, axis=0, keepdims=True) * inv_b
    inv_std = lax.rsqrt(var + jnp.float32(eps))
    return diff * inv_std * gamma + beta


def _matmul_bn_kernel_f32out(x_ref, w_ref, g_ref, b_ref, o_ref, *, batch, eps):
    k = pl.program_id(1)

    @pl.when(k == 0)
    def _():
        o_ref[...] = jnp.zeros_like(o_ref)

    o_ref[...] += jnp.dot(x_ref[...], w_ref[...],
                          preferred_element_type=jnp.float32)

    @pl.when(k == pl.num_programs(1) - 1)
    def _():
        o_ref[...] = _bn_normalize(o_ref[...],
                                   g_ref[...].astype(jnp.float32),
                                   b_ref[...].astype(jnp.float32), batch, eps)


def _matmul_bn_kernel_acc(x_ref, w_ref, g_ref, b_ref, o_ref, acc_ref, *,
                          batch, eps):
    k = pl.program_id(1)

    @pl.when(k == 0)
    def _():
        acc_ref[...] = jnp.zeros_like(acc_ref)

    acc_ref[...] += jnp.dot(x_ref[...], w_ref[...],
                            preferred_element_type=jnp.float32)

    @pl.when(k == pl.num_programs(1) - 1)
    def _():
        out = _bn_normalize(acc_ref[...],
                            g_ref[...].astype(jnp.float32),
                            b_ref[...].astype(jnp.float32), batch, eps)
        o_ref[...] = out.astype(o_ref.dtype)


# ----------------------------------------------------------------------------
# Wrappers
# ----------------------------------------------------------------------------
def linear_pallas(x, w_t, b=None, *, tm=_TM_DEFAULT, tn=_TN_DEFAULT,
                  tk=_TK_DEFAULT, compute_dtype=None):
    """y = x @ w_t (+ b).

    x: (B, K); w_t: (K', N) with K' >= K (extra rows must be zero-padding);
    b: (N,), (1, N) or None.  Output dtype = x.dtype; MXU operands are cast to
    `compute_dtype` (bf16 recommended), accumulation is always f32.
    """
    B, K = x.shape
    Kw, N = w_t.shape
    assert Kw >= K
    out_dtype = jnp.dtype(x.dtype)
    cdtype = jnp.dtype(compute_dtype) if compute_dtype is not None else out_dtype
    in_itemsize = cdtype.itemsize
    out_itemsize = out_dtype.itemsize
    sub = _sublane_multiple(cdtype)

    # Tile sizes: MXU/lane friendly, shrunk for small problems.  (v6e/v7x MXUs
    # are 2x256^2; for large problems the 512/1024 defaults keep them full.)
    tk = min(tk, _round_up(Kw, 128))
    tn = min(tn, _round_up(N, 128))
    tm = min(tm, _round_up(B, sub))
    Kp, Np, Bp = _round_up(Kw, tk), _round_up(N, tn), _round_up(B, tm)

    xp = _pad2(x.astype(cdtype), Bp, Kp)
    wp = _pad2(w_t.astype(cdtype), Kp, Np)

    grid = (Bp // tm, Np // tn, Kp // tk)
    cost = pl.CostEstimate(
        flops=int(2 * Bp * Kp * Np),
        transcendentals=0,
        bytes_accessed=int((Bp * Kp + Kp * Np) * in_itemsize
                           + Bp * Np * out_itemsize
                           + (Np * 4 if b is not None else 0)),
    )
    compiler_params = pltpu.CompilerParams(
        dimension_semantics=("parallel", "parallel", "arbitrary"),
        vmem_limit_bytes=_vmem_budget_bytes(),
    )
    out_shape = jax.ShapeDtypeStruct((Bp, Np), out_dtype)
    x_spec = pl.BlockSpec((tm, tk), lambda i, j, k: (i, k))
    # Note: on v5e, if small-batch profiles show exposed weight DMA, bump this
    # stream to pipeline_mode=pl.Buffered(3).
    w_spec = pl.BlockSpec((tk, tn), lambda i, j, k: (k, j))
    o_spec = pl.BlockSpec((tm, tn), lambda i, j, k: (i, j))
    f32_out = out_dtype == jnp.dtype(jnp.float32)

    if b is not None:
        bp = _pad2(jnp.asarray(b, jnp.float32).reshape(1, -1), 1, Np)
        b_spec = pl.BlockSpec((1, tn), lambda i, j, k: (0, j))
        if f32_out:
            out = pl.pallas_call(
                _matmul_bias_kernel_f32out, out_shape=out_shape, grid=grid,
                in_specs=[x_spec, w_spec, b_spec], out_specs=o_spec,
                compiler_params=compiler_params, cost_estimate=cost,
            )(xp, wp, bp)
        else:
            out = pl.pallas_call(
                _matmul_bias_kernel_acc, out_shape=out_shape, grid=grid,
                in_specs=[x_spec, w_spec, b_spec], out_specs=o_spec,
                scratch_shapes=[pltpu.VMEM((tm, tn), jnp.float32)],
                compiler_params=compiler_params, cost_estimate=cost,
            )(xp, wp, bp)
    else:
        if f32_out:
            out = pl.pallas_call(
                _matmul_kernel_f32out, out_shape=out_shape, grid=grid,
                in_specs=[x_spec, w_spec], out_specs=o_spec,
                compiler_params=compiler_params, cost_estimate=cost,
            )(xp, wp)
        else:
            out = pl.pallas_call(
                _matmul_kernel_acc, out_shape=out_shape, grid=grid,
                in_specs=[x_spec, w_spec], out_specs=o_spec,
                scratch_shapes=[pltpu.VMEM((tm, tn), jnp.float32)],
                compiler_params=compiler_params, cost_estimate=cost,
            )(xp, wp)

    if Bp != B or Np != N:
        out = out[:B, :N]
    return out


def linear_bn_pallas(x, w_t, gamma, beta, eps=1e-5, *, tn=None, tk=None,
                     compute_dtype=None):
    """Fused (x @ w_t) + training-mode BatchNorm1d over axis 0 (biased var).

    The full (padded) batch stays resident per feature-column tile so batch
    statistics are exact; no (B, N) intermediate round-trips HBM.
    running_mean / running_var are not tracked (training-mode forward only).
    """
    B, K = x.shape
    Kw, N = w_t.shape
    assert Kw >= K
    out_dtype = jnp.dtype(x.dtype)
    cdtype = jnp.dtype(compute_dtype) if compute_dtype is not None else out_dtype
    in_itemsize = cdtype.itemsize
    out_itemsize = out_dtype.itemsize
    sub = _sublane_multiple(cdtype)

    Bp = _round_up(B, sub)
    Kp, Np = _feature_padding(Kw, N)
    f32_out = out_dtype == jnp.dtype(jnp.float32)
    budget = _vmem_budget_bytes()

    if tk is None or tn is None:
        tk_fit, tn_fit = _fit_bn_tiles(Bp, Kp, Np, in_itemsize, out_itemsize,
                                       needs_acc_scratch=not f32_out,
                                       budget=budget)
        if tk is None:
            tk = tk_fit
        if tn is None:
            tn = tn_fit
    tk = min(tk, Kp)
    tn = min(tn, Np)
    Kp = _round_up(Kp, tk)
    Np = _round_up(Np, tn)

    # Zero-padded batch rows produce zero matmul rows; statistics divide by the
    # true B and mask padded rows, so results are unaffected.
    xp = _pad2(x.astype(cdtype), Bp, Kp)
    wp = _pad2(w_t.astype(cdtype), Kp, Np)
    gp = _pad2(jnp.asarray(gamma, jnp.float32).reshape(1, -1), 1, Np)
    bp = _pad2(jnp.asarray(beta, jnp.float32).reshape(1, -1), 1, Np)

    n_tiles_n = Np // tn
    grid = (n_tiles_n, Kp // tk)
    cost = pl.CostEstimate(
        flops=int(2 * Bp * Kp * Np + 8 * Bp * Np),
        transcendentals=int(Np),
        # X is re-streamed once per N tile under the full-batch-resident plan.
        bytes_accessed=int((n_tiles_n * Bp * Kp + Kp * Np) * in_itemsize
                           + 2 * Np * 4 + Bp * Np * out_itemsize),
    )
    # TODO(synk): on v7x with a single N tile one TensorCore idles; a cross-core
    # batch-split with a stats reduction would recover it for small-N heads.
    compiler_params = pltpu.CompilerParams(
        dimension_semantics=("parallel", "arbitrary"),
        vmem_limit_bytes=budget,
    )
    in_specs = [
        pl.BlockSpec((Bp, tk), lambda j, k: (0, k)),
        pl.BlockSpec((tk, tn), lambda j, k: (k, j)),
        pl.BlockSpec((1, tn), lambda j, k: (0, j)),
        pl.BlockSpec((1, tn), lambda j, k: (0, j)),
    ]
    out_specs = pl.BlockSpec((Bp, tn), lambda j, k: (0, j))
    out_shape = jax.ShapeDtypeStruct((Bp, Np), out_dtype)

    if f32_out:
        kernel = functools.partial(_matmul_bn_kernel_f32out, batch=B,
                                   eps=float(eps))
        scratch = []
    else:
        kernel = functools.partial(_matmul_bn_kernel_acc, batch=B,
                                   eps=float(eps))
        scratch = [pltpu.VMEM((Bp, tn), jnp.float32)]

    out = pl.pallas_call(
        kernel, out_shape=out_shape, grid=grid,
        in_specs=in_specs, out_specs=out_specs, scratch_shapes=scratch,
        compiler_params=compiler_params, cost_estimate=cost,
    )(xp, wp, gp, bp)

    if Bp != B or Np != N:
        out = out[:B, :N]
    return out


class LinearLayer:
    """JAX/Pallas port of the PyTorch LinearLayer module.

    Weights / bias / BN params are pre-padded (to lane/tile quanta) and the
    weight pre-cast to `compute_dtype` once at construction, so per-call work
    is just the activation pad/cast and the fused kernel.
    """

    def __init__(self, in_features, out_features, use_bias=True, use_bn=False,
                 key=None, dtype=jnp.float32, compute_dtype=jnp.bfloat16):
        self.in_features = in_features
        self.out_features = out_features
        self.use_bias = use_bias
        self.use_bn = use_bn
        self.compute_dtype = jnp.dtype(compute_dtype)
        if key is None:
            key = jax.random.PRNGKey(0)
        kw, kb = jax.random.split(key)
        bound = 1.0 / (in_features ** 0.5)      # PyTorch nn.Linear default init
        Kp, Np = _feature_padding(in_features, out_features)
        # Stored pre-transposed (in, out), pre-padded and pre-cast for the MXU.
        w = jax.random.uniform(kw, (in_features, out_features), dtype=dtype,
                               minval=-bound, maxval=bound)
        self.w_t = _pad2(w, Kp, Np).astype(self.compute_dtype)
        self.has_linear_bias = use_bias and (not use_bn)
        if self.has_linear_bias:
            bias = jax.random.uniform(kb, (out_features,), dtype=dtype,
                                      minval=-bound, maxval=bound)
            self.b = _pad2(bias.astype(jnp.float32).reshape(1, -1), 1, Np)
        else:
            self.b = None
        if use_bn:
            # BatchNorm1d affine params (PyTorch init: weight=1, bias=0).
            # TODO(synk): running_mean / running_var (inference-mode stats) are
            # not tracked; only the training-mode forward is implemented.
            self.bn_gamma = _pad2(jnp.ones((1, out_features), jnp.float32), 1, Np)
            self.bn_beta = _pad2(jnp.zeros((1, out_features), jnp.float32), 1, Np)
            self.bn_eps = 1e-5

    def __call__(self, x):
        if self.use_bn:
            y = linear_bn_pallas(x, self.w_t, self.bn_gamma, self.bn_beta,
                                 self.bn_eps, compute_dtype=self.compute_dtype)
        else:
            y = linear_pallas(x, self.w_t, self.b,
                              compute_dtype=self.compute_dtype)
        if y.shape[1] != self.out_features:
            y = y[:, :self.out_features]
        return y


if __name__ == "__main__":
    key = jax.random.PRNGKey(0)
    k_x, k_p1, k_p2, k_x3, k_w3, k_b3 = jax.random.split(key, 6)

    def bf16_round(a):
        return a.astype(jnp.bfloat16).astype(jnp.float32)

    # ---------------- Case 1 & 2: module-native small shapes -----------------
    batch, in_features, out_features = 8, 32, 64
    x = jax.random.normal(k_x, (batch, in_features), dtype=jnp.float32)
    x_r = bf16_round(x)

    # Case 1: use_bias=True, use_bn=False -> Linear with bias
    layer = LinearLayer(in_features, out_features, use_bias=True, use_bn=False,
                        key=k_p1)
    y = layer(x)
    jax.block_until_ready(y)
    w1 = layer.w_t[:in_features, :out_features].astype(jnp.float32)
    y_ref = x_r @ w1 + layer.b[0, :out_features]
    assert y.shape == (batch, out_features)
    assert jnp.allclose(y, y_ref, atol=2e-3, rtol=2e-3), \
        float(jnp.max(jnp.abs(y - y_ref)))

    # Case 1b: no bias, no BN
    layer_nb = LinearLayer(in_features, out_features, use_bias=False,
                           use_bn=False, key=k_p1)
    y_nb = layer_nb(x)
    jax.block_until_ready(y_nb)
    w_nb = layer_nb.w_t[:in_features, :out_features].astype(jnp.float32)
    assert jnp.allclose(y_nb, x_r @ w_nb, atol=2e-3, rtol=2e-3)

    # Case 2: use_bn=True -> Linear (no bias) fused with BatchNorm1d
    layer_bn = LinearLayer(in_features, out_features, use_bias=True,
                           use_bn=True, key=k_p2)
    y2 = layer_bn(x)
    jax.block_until_ready(y2)
    w2 = layer_bn.w_t[:in_features, :out_features].astype(jnp.float32)
    lin = x_r @ w2
    mu = lin.mean(axis=0, keepdims=True)
    var = ((lin - mu) ** 2).mean(axis=0, keepdims=True)
    y2_ref = ((lin - mu) / jnp.sqrt(var + layer_bn.bn_eps)
              * layer_bn.bn_gamma[0, :out_features]
              + layer_bn.bn_beta[0, :out_features])
    assert y2.shape == (batch, out_features)
    assert jnp.allclose(y2, y2_ref, atol=5e-3, rtol=5e-3), \
        float(jnp.max(jnp.abs(y2 - y2_ref)))

    # ------ Case 3: multi-tile grid (exercise accumulator + epilogues) -------
    B3, K3, N3 = 32, 256, 384
    x3 = jax.random.normal(k_x3, (B3, K3), dtype=jnp.float32)
    w3 = jax.random.normal(k_w3, (K3, N3), dtype=jnp.float32) * 0.05
    b3 = jax.random.normal(k_b3, (N3,), dtype=jnp.float32) * 0.5
    x3_r, w3_r = bf16_round(x3), bf16_round(w3)

    y3 = linear_pallas(x3, w3, b3, tm=16, tn=128, tk=128,
                       compute_dtype=jnp.bfloat16)          # grid (2, 3, 2)
    jax.block_until_ready(y3)
    y3_ref = x3_r @ w3_r + b3
    assert jnp.allclose(y3, y3_ref, atol=2e-2, rtol=2e-2), \
        float(jnp.max(jnp.abs(y3 - y3_ref)))

    g3 = jnp.full((N3,), 1.5, jnp.float32)
    beta3 = jnp.full((N3,), 0.25, jnp.float32)
    y4 = linear_bn_pallas(x3, w3, g3, beta3, tn=128, tk=128,
                          compute_dtype=jnp.bfloat16)        # grid (3, 2)
    jax.block_until_ready(y4)
    lin3 = x3_r @ w3_r
    mu3 = lin3.mean(axis=0, keepdims=True)
    var3 = ((lin3 - mu3) ** 2).mean(axis=0, keepdims=True)
    y4_ref = (lin3 - mu3) / jnp.sqrt(var3 + 1e-5) * g3 + beta3
    assert jnp.allclose(y4, y4_ref, atol=2e-2, rtol=2e-2), \
        float(jnp.max(jnp.abs(y4 - y4_ref)))

    # ------ Case 4: bf16 in / bf16 out (exercise the acc-scratch kernels) ----
    x4 = x3.astype(jnp.bfloat16)
    w4 = w3.astype(jnp.bfloat16)
    y5 = linear_pallas(x4, w4, b3)
    y5b = linear_pallas(x4, w4)
    y6 = linear_bn_pallas(x4, w4, g3, beta3)
    jax.block_until_ready((y5, y5b, y6))
    assert jnp.allclose(y5.astype(jnp.float32), x3_r @ w3_r + b3,
                        atol=5e-2, rtol=5e-2)
    assert jnp.allclose(y5b.astype(jnp.float32), x3_r @ w3_r,
                        atol=5e-2, rtol=5e-2)
    assert jnp.allclose(y6.astype(jnp.float32), y4_ref, atol=5e-2, rtol=5e-2)

    print("KERNEL_OK")
</pallas_src>

<mosaic_0001>
module attributes {stable_mosaic.version = 11 : i64} {
  func.func @_matmul_bias_kernel_f32out(%arg0: i32, %arg1: i32, %arg2: i32, %arg3: memref<16x128xbf16, #tpu.memory_space<vmem>>, %arg4: memref<128x128xbf16, #tpu.memory_space<vmem>>, %arg5: memref<1x128xf32, #tpu.memory_space<vmem>>, %arg6: memref<16x128xf32, #tpu.memory_space<vmem>>) attributes {dimension_semantics = [#tpu.dimension_semantics<parallel>, #tpu.dimension_semantics<parallel>, #tpu.dimension_semantics<arbitrary>], iteration_bounds = array<i64: 1, 1, 1>, scalar_prefetch = 0 : i64, scratch_operands = 0 : i64, tpu.core_type = #tpu.core_type<tc>, window_params = [{transform_indices = @transform_0, window_bounds = array<i64: 16, 128>}, {transform_indices = @transform_1, window_bounds = array<i64: 128, 128>}, {transform_indices = @transform_2, window_bounds = array<i64: 1, 128>}, {transform_indices = @transform_3, window_bounds = array<i64: 16, 128>}]} {
    %c0_i32 = arith.constant 0 : i32
    %0 = arith.cmpi eq, %arg2, %c0_i32 : i32
    %1 = arith.extui %0 : i1 to i32
    %c0_i32_0 = arith.constant 0 : i32
    %2 = arith.cmpi ne, %1, %c0_i32_0 : i32
    scf.if %2 {
      %cst_10 = arith.constant 0.000000e+00 : f32
      %12 = vector.broadcast %cst_10 : f32 to vector<16x128xf32>
      %c0_11 = arith.constant 0 : index
      %c0_12 = arith.constant 0 : index
      %13 = vector.load %arg6[%c0_11, %c0_12] : memref<16x128xf32, #tpu.memory_space<vmem>>, vector<16x128xf32>
      tpu.vector_store %arg6[%c0_11, %c0_12], %12 {strides = array<i32>} : memref<16x128xf32, #tpu.memory_space<vmem>>, vector<16x128xf32>,
    } else {
    }
    %c0 = arith.constant 0 : index
    %c0_1 = arith.constant 0 : index
    %3 = vector.load %arg6[%c0, %c0_1] : memref<16x128xf32, #tpu.memory_space<vmem>>, vector<16x128xf32>
    %c0_2 = arith.constant 0 : index
    %c0_3 = arith.constant 0 : index
    %4 = vector.load %arg3[%c0_2, %c0_3] : memref<16x128xbf16, #tpu.memory_space<vmem>>, vector<16x128xbf16>
    %c0_4 = arith.constant 0 : index
    %c0_5 = arith.constant 0 : index
    %5 = vector.load %arg4[%c0_4, %c0_5] : memref<128x128xbf16, #tpu.memory_space<vmem>>, vector<128x128xbf16>
    %cst = arith.constant dense<0.000000e+00> : vector<16x128xf32>
    %6 = tpu.matmul %4, %5, %cst {dimension_numbers = #tpu.dot_dimension_numbers<[1], [0], [0], [1], [0, 0, 1, 1], [], []>} : vector<16x128xbf16>, vector<128x128xbf16>, vector<16x128xf32> -> vector<16x128xf32>
    %7 = arith.addf %3, %6 : vector<16x128xf32>
    %c0_6 = arith.constant 0 : index
    %c0_7 = arith.constant 0 : index
    %8 = vector.load %arg6[%c0_6, %c0_7] : memref<16x128xf32, #tpu.memory_space<vmem>>, vector<16x128xf32>
    tpu.vector_store %arg6[%c0_6, %c0_7], %7 {strides = array<i32>} : memref<16x128xf32, #tpu.memory_space<vmem>>, vector<16x128xf32>,
    %c0_i32_8 = arith.constant 0 : i32
    %9 = arith.cmpi eq, %arg2, %c0_i32_8 : i32
    %10 = arith.extui %9 : i1 to i32
    %c0_i32_9 = arith.constant 0 : i32
    %11 = arith.cmpi ne, %10, %c0_i32_9 : i32
    scf.if %11 {
      %c0_10 = arith.constant 0 : index
      %c0_11 = arith.constant 0 : index
      %12 = vector.load %arg6[%c0_10, %c0_11] : memref<16x128xf32, #tpu.memory_space<vmem>>, vector<16x128xf32>
      %c0_12 = arith.constant 0 : index
      %c0_13 = arith.constant 0 : index
      %13 = vector.load %arg5[%c0_12, %c0_13] : memref<1x128xf32, #tpu.memory_space<vmem>>, vector<1x128xf32>
      %14 = vector.broadcast %13 : vector<1x128xf32> to vector<16x128xf32>
      %15 = arith.addf %12, %14 : vector<16x128xf32>
      %c0_14 = arith.constant 0 : index
      %c0_15 = arith.constant 0 : index
      %16 = vector.load %arg6[%c0_14, %c0_15] : memref<16x128xf32, #tpu.memory_space<vmem>>, vector<16x128xf32>
      tpu.vector_store %arg6[%c0_14, %c0_15], %15 {strides = array<i32>} : memref<16x128xf32, #tpu.memory_space<vmem>>, vector<16x128xf32>,
    } else {
    }
    return
  }
  func.func @transform_0(%arg0: i32, %arg1: i32, %arg2: i32) -> (i32, i32) {
    %c0_i32 = arith.constant 0 : i32
    return %arg0, %arg2 : i32, i32
  }
  func.func @transform_1(%arg0: i32, %arg1: i32, %arg2: i32) -> (i32, i32) {
    %c0_i32 = arith.constant 0 : i32
    return %arg2, %arg1 : i32, i32
  }
  func.func @transform_2(%arg0: i32, %arg1: i32, %arg2: i32) -> (i32, i32) {
    %c0_i32 = arith.constant 0 : i32
    %c0_i32_0 = arith.constant 0 : i32
    return %c0_i32, %arg1 : i32, i32
  }
  func.func @transform_3(%arg0: i32, %arg1: i32, %arg2: i32) -> (i32, i32) {
    %c0_i32 = arith.constant 0 : i32
    return %arg0, %arg1 : i32, i32
  }
}

</mosaic_0001>

<bundles_post_ra>
// kernel: tpu_custom_call.1
= control target key start
LH: loop header
LB: loop body
LE: loop exit
PB: predicated region body
PF: predicated region fallthrough
CT: control target
= control target key end

     0   :  { %8 = vsyncpa [#allocation3], 0  ;;  %s400_s0 = inlined_call_operand.hbm [shape: bf16[16,128], index: 0, kind: input, shape index: {}]   ;;  %s401_s1 = inlined_call_operand.hbm [shape: bf16[128,128], index: 1, kind: input, shape index: {}]   ;;  %s402_s2 = inlined_call_operand.vmem [shape: f32[1,128], index: 2, kind: input, shape index: {}]   ;;  %s403_s3 = inlined_call_operand.hbm [shape: f32[16,128], index: 3, kind: output, shape index: {}]  }
   0x1   :  { %9 = vsyncpa [#allocation6], 0 }
   0x2   :  { %10 = vsyncpa [#allocation4], 0  ;;  %s332_s12 = smov [#allocation2]   ;;  %s260_s16 = scalar_lea.hbm %s400_s0, 128 }
   0x3   :  { %s16_s13 = sshll.u32 %s332_s12, 4  ;;  %p261_p0 = scmp.ne.s32.totalorder %s400_s0, %s260_s16  ;;  %s17_s13 = int_to_ptr.vmem [resolvable:$true] %s16_s13 }
   0x4   :  { %p264_p1 = scmp.lt.u32.totalorder %s260_s16, %s400_s0 }
   0x6   :  { %p266_p2 = pnand %p264_p1, %p261_p0 }
   0x8   :  { %269 = shalt.err (!%p266_p2)
}
   0x9   :  { %s270_s21 = scalar_lea.vmem %s17_s13, 128  ;;  %p275_p4 = scmp.lt.s32.totalorder %s17_s13, %s17_s13 }
   0xa   :  { %p271_p3 = scmp.ne.s32.totalorder %s17_s13, %s270_s21  ;;  %p276_p5 = scmp.lt.s32.totalorder %s270_s21, %s270_s21 }
   0xc   :  { %p277_p6 = por %p276_p5, %p275_p4 }
   0xe   :  { %p278_p7 = pnand %p277_p6, %p271_p3 }
  0x10   :  { %281 = shalt.err (!%p278_p7)
}
  0x11   :  { %s333_s22 = smov 64   ;;  %s334_s23 = smov 4  }
  0x12   :  { %22 = dma.hbm_to_vmem [thread:$0]  %s400_s0, 128, %s17_s13, [#allocation3], %s333_s22, %s333_s22, %s334_s23  }
  0x13   :  { %s335_s26 = smov [#allocation5]   ;;  %s282_s30 = scalar_lea.hbm %s401_s1, 1024 }
  0x14   :  { %s28_s27 = sshll.u32 %s335_s26, 4  ;;  %p283_p8 = scmp.ne.s32.totalorder %s401_s1, %s282_s30  ;;  %s29_s27 = int_to_ptr.vmem [resolvable:$true] %s28_s27 }
  0x15   :  { %p286_p9 = scmp.lt.u32.totalorder %s282_s30, %s401_s1 }
  0x17   :  { %p288_p10 = pnand %p286_p9, %p283_p8 }
  0x19   :  { %291 = shalt.err (!%p288_p10)
}
  0x1a   :  { %s292_s8 = scalar_lea.vmem %s29_s27, 1024  ;;  %p297_p12 = scmp.lt.s32.totalorder %s29_s27, %s29_s27 }
  0x1b   :  { %p293_p11 = scmp.ne.s32.totalorder %s29_s27, %s292_s8  ;;  %p298_p13 = scmp.lt.s32.totalorder %s292_s8, %s292_s8 }
  0x1d   :  { %p299_p0 = por %p298_p13, %p297_p12 }
  0x1f   :  { %p300_p1 = pnand %p299_p0, %p293_p11 }
  0x21   :  { %303 = shalt.err (!%p300_p1)
}
  0x22   :  { %34 = dma.hbm_to_vmem [thread:$0]  %s401_s1, 1024, %s29_s27, [#allocation6], %s333_s22, %s333_s22, %s334_s23  }
  0x23   :  { %326 = dma.done.wait [#allocation3], 128  }
  0x24   :  { %327 = vsyncadd [#allocation3], 4294967168 }
  0x25   :  { %328 = dma.done.wait [#allocation6], 1024  }
  0x26   :  { %329 = vsyncadd [#allocation6], 4294966272  ;;  %v336_v0 = vmov 0.0   ;;  %vm337_vm0 = vmmov 0   ;;  %v251_v1 = vld [vmem:[#allocation5] sm:$0xff]   ;;  %v252_v2 = vld [vmem:[#allocation5 + $0x8] sm:$0xff]  }
  0x27   :  { %222 = vmatprep.subr.bf16.mxu0 %v336_v0  ;;  %238 = vmatprep.mubr.msk.bf16.mxu0 %vm337_vm0, %v336_v0  ;;  %v253_v3 = vld [vmem:[#allocation5 + $0x10] sm:$0xff]   ;;  %v254_v4 = vld [vmem:[#allocation5 + $0x18] sm:$0xff]   ;;  %v255_v5 = vld [vmem:[#allocation5 + $0x20] sm:$0xff]   ;;  %s338_s11 = smov [#allocation7]  }
  0x28   :  { %223 = vmatpush3.bf16.msra.mxu0 %v251_v1  ;;  %v256_v6 = vld [vmem:[#allocation5 + $0x28] sm:$0xff]   ;;  %v257_v7 = vld [vmem:[#allocation5 + $0x30] sm:$0xff]   ;;  %v258_v8 = vld [vmem:[#allocation5 + $0x38] sm:$0xff]   ;;  %s190_s12 = sshll.u32 %s338_s11, 4  ;;  %s191_s12 = int_to_ptr.vmem [resolvable:$true] %s190_s12 }
  0x29   :  { %224 = vmatprep.subr.bf16.mxu0 %v336_v0  ;;  %v259_v9 = vld [vmem:[#allocation2] sm:$0xff]   ;;  %s304_s13 = scalar_lea.vmem %s191_s12, 256  ;;  %p309_p3 = scmp.lt.s32.totalorder %s191_s12, %s191_s12 }
  0x2a   :  { %v212_v11 = vld [vmem:[%s402_s2] ss:$0 sm:$0xff]  ;;  %p305_p2 = scmp.ne.s32.totalorder %s191_s12, %s304_s13  ;;  %p310_p4 = scmp.lt.s32.totalorder %s304_s13, %s304_s13 }
  0x2c   :  { %225 = vmatpush3.bf16.msra.mxu0 %v252_v2  ;;  %p311_p5 = por %p310_p4, %p309_p3 }
  0x2d   :  { %226 = vmatprep.subr.bf16.mxu0 %v336_v0 }
  0x2e   :  { %p312_p6 = pnand %p311_p5, %p305_p2 }
  0x30   :  { %227 = vmatpush3.bf16.msra.mxu0 %v253_v3 }
  0x31   :  { %228 = vmatprep.subr.bf16.mxu0 %v336_v0 }
  0x34   :  { %229 = vmatpush3.bf16.msra.mxu0 %v254_v4 }
  0x35   :  { %230 = vmatprep.subr.bf16.mxu0 %v336_v0 }
  0x38   :  { %231 = vmatpush3.bf16.msra.mxu0 %v255_v5 }
  0x39   :  { %232 = vmatprep.subr.bf16.mxu0 %v336_v0 }
  0x3c   :  { %233 = vmatpush3.bf16.msra.mxu0 %v256_v6 }
  0x3d   :  { %234 = vmatprep.subr.bf16.mxu0 %v336_v0 }
  0x40   :  { %235 = vmatpush3.bf16.msra.mxu0 %v257_v7 }
  0x41   :  { %236 = vmatprep.subr.bf16.mxu0 %v336_v0 }
  0x44   :  { %237 = vmatpush3.bf16.msra.mxu0 %v258_v8 }
  0x47   :  { %239 = vmatmul.mubr.bf16.vlgmr.msra.gmra.mrb[0].mxu0 %v259_v9 }
 0x11a   :  { %v158_v10 = vpop.f32.mrb[0].mxu0 }
 0x11b   :  { %v240_v12 = vpop.f32.mrb[1].mxu0  ;;  %v181_v15 = vadd.f32 %v212_v11, %v158_v10 }
 0x11c   :  { %v161_v13 = vpop.f32.mrb[2].mxu0 }
 0x11d   :  { %v241_v14 = vpop.f32.mrb[3].mxu0  ;;  %v182_v16 = vadd.f32 %v212_v11, %v161_v13  ;;  %183 = vst [vmem:[#allocation7] sm:$0xff] %v181_v15 }
 0x11f   :  { %184 = vst [vmem:[#allocation7 + $0x8] sm:$0xff] %v182_v16 }
 0x120   :  { %315 = shalt.err (!%p312_p6)
}
 0x121   :  { %s316_s2 = scalar_lea.hbm %s403_s3, 256 }
 0x122   :  { %p317_p7 = scmp.ne.s32.totalorder %s403_s3, %s316_s2  ;;  %p320_p8 = scmp.lt.u32.totalorder %s316_s2, %s403_s3 }
 0x124   :  { %p322_p9 = pnand %p320_p8, %p317_p7 }
 0x126   :  { %325 = shalt.err (!%p322_p9)
}
 0x127   :  { %s339_s20 = smov 128   ;;  %s340_s21 = smov 8  }
 0x128   :  { %196 = dma.vmem_to_hbm [thread:$0]  %s191_s12, 256, %s403_s3, [#allocation4], %s339_s20, %s339_s20, %s340_s21  }
 0x129   :  { %330 = dma.done.wait [#allocation4], 256  }
 0x12a   :  { %331 = vsyncadd [#allocation4], 4294967040 }
 0x12b   :  { %200 = vsyncpa [#allocation3], 1 }
 0x12c   :  { %201 = vsyncpa [#allocation6], 1 }
 0x12d   :  { %202 = vsyncpa [#allocation4], 1 }

</bundles_post_ra>
